<compile_context>
chip_gen: v6e
topology: v6e:2x2x1
jax: 0.10.0
libtpu: 0.0.40
codegen_flags: <defaults>
</compile_context>

<pallas_src>
import jax
import jax.numpy as jnp
from jax.experimental import pallas as pl
from jax.experimental.pallas import tpu as pltpu

# ----------------------------- config (small synthetic CodeGenerator) -----------------
NUM_EMB = 20            # unit vocabulary size
EMB_DIM = 32            # unit embedding dim
NUM_LANGS = 4
LANG_EMB = 8
NUM_SPKRS = 5
SPKR_EMB = 8
MODEL_IN_DIM = EMB_DIM + LANG_EMB + SPKR_EMB          # 48
UPSAMPLE_INIT_CH = 32
UPSAMPLE_RATES = (2, 2)
UPSAMPLE_KSIZES = (4, 4)
RESBLOCK_KSIZES = (3,)                                # num_kernels = 1
RESBLOCK_DILATIONS = ((1, 3),)
CONV_PRE_K = 7
CONV_POST_K = 7
VAR_HIDDEN = 16
VAR_KS = 3
LRELU_SLOPE = 0.1


def get_padding(k, d):
    return (k * d - d) // 2


def _vmem_limit_bytes():
    # Generation-aware scoped-VMEM limit (~48 MiB on v7x, capped at 96 MiB on v5e/v6e).
    try:
        cap = int(pltpu.get_tpu_info().vmem_capacity_bytes)
        return max(16 * 1024 * 1024, min(cap * 3 // 4, 96 * 1024 * 1024))
    except Exception:
        return 32 * 1024 * 1024


_VMEM_LIMIT = _vmem_limit_bytes()


# ----------------------------- fused multi-conv stage kernel --------------------------
def _apply_act(v, kind):
    if kind == "leaky_relu":
        return jnp.where(v >= 0, v, LRELU_SLOPE * v)
    if kind == "relu":
        return jnp.maximum(v, 0.0)
    if kind == "tanh":
        return jnp.tanh(v)
    return v


_STATIC_KEYS = ("K", "d", "pad_l", "pad_r", "pre_act", "post_act", "has_ln", "needs_pad")


def _conv_meta(w, b, K, dil, pad_l, pad_r, pre_act=None, post_act=None, ln=None):
    """Per-conv record: arrays (w (K,C_out,C_in), b (C_out,1), optional LN g/b) + static meta."""
    assert pad_l + pad_r == dil * (K - 1), "only length-preserving convs are supported"
    return {
        "w": jnp.asarray(w, jnp.float32),
        "b": jnp.asarray(b, jnp.float32).reshape(-1, 1),
        "ln": None if ln is None else (jnp.asarray(ln[0], jnp.float32).reshape(-1, 1),
                                       jnp.asarray(ln[1], jnp.float32).reshape(-1, 1)),
        "K": int(K), "d": int(dil), "pad_l": int(pad_l), "pad_r": int(pad_r),
        "pre_act": pre_act, "post_act": post_act,
        "has_ln": ln is not None, "needs_pad": K > 1,
    }


def _conv_in_kernel(xval, w_ref, b_ref, ln_refs, pad_ref, meta):
    """[pre-act] -> same-length Conv1d (K per-tap MXU matmuls, no im2col slab)
    + bias -> [post-act] -> [LayerNorm over channels].  Zero halo is materialized in a
    VMEM scratch AFTER the pre-activation (matches torch zero padding exactly)."""
    _, T = xval.shape
    K, d, pad_l = meta["K"], meta["d"], meta["pad_l"]
    pre = _apply_act(xval, meta["pre_act"])
    if pad_ref is None:                                   # K == 1, no halo
        acc = jnp.dot(w_ref[0], pre, preferred_element_type=jnp.float32)
    else:
        pad_ref[...] = jnp.zeros(pad_ref.shape, jnp.float32)
        pad_ref[:, pad_l:pad_l + T] = pre
        acc = jnp.dot(w_ref[0], pad_ref[:, 0:T], preferred_element_type=jnp.float32)
        for k in range(1, K):
            acc = acc + jnp.dot(w_ref[k], pad_ref[:, k * d:k * d + T],
                                preferred_element_type=jnp.float32)
    acc = acc + b_ref[...]
    acc = _apply_act(acc, meta["post_act"])
    if ln_refs is not None:                               # LayerNorm over channels
        g_ref, beta_ref = ln_refs
        mu = jnp.mean(acc, axis=0, keepdims=True)
        var = jnp.mean(jnp.square(acc - mu), axis=0, keepdims=True)
        acc = (acc - mu) * jax.lax.rsqrt(var + 1e-5) * g_ref[...] + beta_ref[...]
    return acc


def _make_stage_kernel(static_plan):
    """static_plan: tuple of ('conv', meta) / ('res', meta1, meta2) with static metas only.
    Refs: x, then (w, b[, ln_g, ln_b]) per conv in plan order, output, then one pad
    scratch per conv that needs one."""
    flat = tuple(m for entry in static_plan for m in entry[1:])

    def kernel(*refs):
        it = iter(refs)
        x_ref = next(it)
        conv_refs = []
        for m in flat:
            w_ref = next(it)
            b_ref = next(it)
            ln_refs = (next(it), next(it)) if m["has_ln"] else None
            conv_refs.append((w_ref, b_ref, ln_refs))
        o_ref = next(it)
        pad_refs = [next(it) if m["needs_pad"] else None for m in flat]

        x = x_ref[...]                                    # activation stays in VMEM/vregs
        ci = 0
        for entry in static_plan:
            if entry[0] == "conv":
                w_ref, b_ref, ln_refs = conv_refs[ci]
                x = _conv_in_kernel(x, w_ref, b_ref, ln_refs, pad_refs[ci], flat[ci])
                ci += 1
            else:                                         # x = x + c2(lrelu(c1(lrelu(x))))
                w1, b1, l1 = conv_refs[ci]
                h = _conv_in_kernel(x, w1, b1, l1, pad_refs[ci], flat[ci])
                w2, b2, l2 = conv_refs[ci + 1]
                h = _conv_in_kernel(h, w2, b2, l2, pad_refs[ci + 1], flat[ci + 1])
                x = x + h
                ci += 2
        o_ref[...] = x

    return kernel


def _full_block(shape):
    nd = len(shape)
    return pl.BlockSpec(tuple(shape), lambda i, _nd=nd: (0,) * _nd)


def _run_stage(x, stage):
    """Run one fused stage (several convs / resblocks) as a single pallas_call."""
    plan = stage["plan"]
    flat = [m for entry in plan for m in entry[1:]]
    _, T = x.shape

    operands = [x]
    in_specs = [_full_block(x.shape)]
    for m in flat:
        operands += [m["w"], m["b"]]
        in_specs += [_full_block(m["w"].shape), _full_block(m["b"].shape)]
        if m["has_ln"]:
            operands += [m["ln"][0], m["ln"][1]]
            in_specs += [_full_block(m["ln"][0].shape), _full_block(m["ln"][1].shape)]

    C_out = int(flat[-1]["w"].shape[1])
    scratch = [pltpu.VMEM((int(m["w"].shape[2]), T + m["pad_l"] + m["pad_r"]), jnp.float32)
               for m in flat if m["needs_pad"]]
    static_plan = tuple(
        (entry[0],) + tuple({k: m[k] for k in _STATIC_KEYS} for m in entry[1:])
        for entry in plan)

    return pl.pallas_call(
        _make_stage_kernel(static_plan),
        grid=(1,),
        out_shape=jax.ShapeDtypeStruct((C_out, T), jnp.float32),
        in_specs=in_specs,
        out_specs=_full_block((C_out, T)),
        scratch_shapes=scratch,
        compiler_params=pltpu.CompilerParams(
            dimension_semantics=("arbitrary",),
            vmem_limit_bytes=_VMEM_LIMIT),
    )(*operands)


# ----------------------------- model pieces (3 kernels for the whole generator) -------
def generator(stages, x):
    """HiFi-GAN generator.  x: (MODEL_IN_DIM, T) -> (1, T * prod(UPSAMPLE_RATES))."""
    for st in stages:
        y = _run_stage(x, st)
        s = st["stride"]
        if s > 1:
            # De-interleave the phase-stacked upsample output: (s*C, T) -> (C, s*T).
            # Tiny XLA transpose/reshape (no MXU work, O(activation) bytes).
            C, T = y.shape[0] // s, y.shape[1]
            y = y.reshape(s, C, T).transpose(1, 2, 0).reshape(C, s * T)
        x = y
    return x


def predict_durations(params, code):
    """code: (T,) int32 -> per-unit durations (T,) int32 (single fused kernel)."""
    x = params["dict"][code].T                                  # (EMB_DIM, T)
    log_dur = _run_stage(x, params["dur_stage"])[0]             # (T,)
    # TODO(synk): dropout (p=0.5) of the VariancePredictor is identity at eval time.
    return jnp.maximum(jnp.round(jnp.exp(log_dur) - 1.0), 1.0).astype(jnp.int32)


def generate_waveform(params, emb_rep, spkr_vec, lang_vec):
    """emb_rep: (L, E) repeated unit embeddings -> waveform (1, L * prod(rates))."""
    L = emb_rep.shape[0]
    x = jnp.concatenate([
        jnp.broadcast_to(lang_vec[:, None], (lang_vec.shape[0], L)),
        emb_rep.T,
        jnp.broadcast_to(spkr_vec[:, None], (spkr_vec.shape[0], L)),
    ], axis=0)                                                  # (MODEL_IN_DIM, L)
    return generator(params["gen_stages"], x)


# ----------------------------- one-time parameter preparation --------------------------
def _prep_convtranspose_stacked(wt, b, stride, padding):
    """Phase-decompose a torch ConvTranspose1d weight (C_in, C_out, K) into ONE conv with
    per-tap stacked weights (K_eff, stride*C_out, C_in): rows [c*C_out:(c+1)*C_out] produce
    output phase c (time index stride*q + c)."""
    C_in, C_out, K = wt.shape
    assert K % stride == 0 and padding < stride
    assert K - stride - 2 * padding == 0, "phase decomposition assumes T_out == stride*T"
    Kp = K // stride
    P = K - 1 - padding
    taps, deltas = [], []
    for c in range(stride):
        k0 = (P - c) % stride
        deltas.append((c - P + k0) // stride)
        taps.append([jnp.transpose(wt[:, :, K - 1 - (k0 + stride * j)], (1, 0))
                     for j in range(Kp)])
    dmin, dmax = min(deltas), max(deltas)
    K_eff = Kp + (dmax - dmin)
    w_st = jnp.zeros((K_eff, stride * C_out, C_in), jnp.float32)
    for c in range(stride):
        off = deltas[c] - dmin
        for j in range(Kp):
            w_st = w_st.at[off + j, c * C_out:(c + 1) * C_out, :].set(taps[c][j])
    b_st = jnp.tile(jnp.asarray(b, jnp.float32).reshape(C_out, 1), (stride, 1))
    return {"w": w_st, "b": b_st, "K": K_eff, "pad_l": -dmin, "pad_r": dmax + Kp - 1}


def prepare_params(raw):
    """Hoist all weight transforms (phase stacking, bias reshape) and build fused-stage plans."""
    # TODO(synk): store weights/activations in bf16 (f32 accumulation) for v6e/v7x MXU rate.
    p = {"dict": raw["dict"], "spkr": raw["spkr"], "lang": raw["lang"]}

    d = raw["dur"]
    kpad = get_padding(VAR_KS, 1)
    p["dur_stage"] = {
        "plan": (
            ("conv", _conv_meta(d["conv1_w"], d["conv1_b"], VAR_KS, 1, kpad, kpad,
                                post_act="relu", ln=(d["ln1_g"], d["ln1_b"]))),
            ("conv", _conv_meta(d["conv2_w"], d["conv2_b"], VAR_KS, 1, kpad, kpad,
                                post_act="relu", ln=(d["ln2_g"], d["ln2_b"]))),
            ("conv", _conv_meta(d["proj_w"], d["proj_b"], 1, 1, 0, 0)),
        ),
        "stride": 1,
    }

    g = raw["gen"]
    assert len(RESBLOCK_KSIZES) == 1, "whole-stage fusion assumes num_kernels == 1"
    ks = RESBLOCK_KSIZES[0]

    def res_entries(rb):
        out = []
        for c1, c2 in zip(rb["convs1"], rb["convs2"]):
            m1 = _conv_meta(c1["w"], c1["b"], ks, c1["d"],
                            get_padding(ks, c1["d"]), get_padding(ks, c1["d"]),
                            pre_act="leaky_relu")
            m2 = _conv_meta(c2["w"], c2["b"], ks, c2["d"],
                            get_padding(ks, c2["d"]), get_padding(ks, c2["d"]),
                            pre_act="leaky_relu")
            out.append(("res", m1, m2))
        return out

    ups = []
    for i, (s, K) in enumerate(zip(UPSAMPLE_RATES, UPSAMPLE_KSIZES)):
        st = _prep_convtranspose_stacked(g["ups"][i]["w"], g["ups"][i]["b"], s, (K - s) // 2)
        ups.append(_conv_meta(st["w"], st["b"], st["K"], 1, st["pad_l"], st["pad_r"],
                              pre_act="leaky_relu"))

    pre_m = _conv_meta(g["conv_pre_w"], g["conv_pre_b"], CONV_PRE_K, 1,
                       (CONV_PRE_K - 1) // 2, (CONV_PRE_K - 1) // 2)
    post_m = _conv_meta(g["conv_post_w"], g["conv_post_b"], CONV_POST_K, 1,
                        (CONV_POST_K - 1) // 2, (CONV_POST_K - 1) // 2,
                        pre_act="leaky_relu", post_act="tanh")

    stages = [{"plan": (("conv", pre_m), ("conv", ups[0])), "stride": UPSAMPLE_RATES[0]}]
    for i in range(1, len(UPSAMPLE_RATES)):
        stages.append({"plan": tuple(res_entries(g["resblocks"][i - 1])) + (("conv", ups[i]),),
                       "stride": UPSAMPLE_RATES[i]})
    stages.append({"plan": tuple(res_entries(g["resblocks"][len(UPSAMPLE_RATES) - 1]))
                           + (("conv", post_m),),
                   "stride": 1})
    p["gen_stages"] = stages
    return p


# ----------------------------- Vocoder wrapper (mirrors the torch module) --------------
class Vocoder:
    def __init__(self, raw_params, lang_spkr_idx_map):
        self.params = prepare_params(raw_params)
        self.lang_spkr_idx_map = lang_spkr_idx_map
        p = self.params
        self._predict_dur = jax.jit(lambda code: predict_durations(p, code))
        self._generate = jax.jit(lambda emb, s, l: generate_waveform(p, emb, s, l))

    def __call__(self, units, lang_list, spkr_list=None, dur_prediction=True):
        if units.ndim == 1:
            units = units[None, :]
        if isinstance(lang_list, str):
            lang_list = [lang_list] * units.shape[0]
        if isinstance(spkr_list, int):
            spkr_list = [spkr_list] * units.shape[0]
        lang_idx_list = [self.lang_spkr_idx_map["multilingual"][l] for l in lang_list]
        if not spkr_list:
            spkr_list = [-1 for _ in range(len(lang_list))]
        spkr_list = [
            self.lang_spkr_idx_map["multispkr"][lang_list[i]][0] if spkr_list[i] == -1 else spkr_list[i]
            for i in range(len(spkr_list))
        ]
        sample = {
            "code": units.reshape(units.shape[0], -1),
            "spkr": jnp.asarray([spkr_list], dtype=jnp.int32).T,   # (B, 1)
            "lang": jnp.asarray([lang_idx_list], dtype=jnp.int32).T,
        }
        return self.code_generator(sample, dur_prediction)

    def code_generator(self, sample, dur_prediction):
        code = sample["code"]                                      # (B, T) int
        B = code.shape[0]
        outs = []
        for b in range(B):
            emb = self.params["dict"][code[b]]                     # (T, E), stays on device
            if dur_prediction:
                assert B == 1, "duration prediction requires batch size 1"
                dur = self._predict_dur(code[b])                   # (T,) int32 on device
                # TODO(synk): one scalar D2H sync fixes the static repeat length; bucket
                # `total` to a small set of lengths to bound per-utterance recompiles.
                total = int(jax.device_get(jnp.sum(dur)))
                emb = jnp.repeat(emb, dur, axis=0, total_repeat_length=total)
            spkr_vec = self.params["spkr"][sample["spkr"][b, 0]]
            lang_vec = self.params["lang"][sample["lang"][b, 0]]
            outs.append(self._generate(emb, spkr_vec, lang_vec))   # (1, T_wav)
        return jnp.stack(outs, axis=0)                             # (B, 1, T_wav)


# ----------------------------- deterministic parameter init ----------------------------
def init_params(key):
    keys = iter(jax.random.split(key, 256))

    def w(shape, scale=0.05):
        return scale * jax.random.normal(next(keys), shape, dtype=jnp.float32)

    def conv_p(cout, cin, k):
        return {"w": w((k, cout, cin)), "b": w((cout,), 0.01)}

    params = {
        "dict": w((NUM_EMB, EMB_DIM), 0.2),
        "spkr": w((NUM_SPKRS, SPKR_EMB), 0.2),
        "lang": w((NUM_LANGS, LANG_EMB), 0.2),
        "dur": {
            "conv1_w": w((VAR_KS, VAR_HIDDEN, EMB_DIM)), "conv1_b": w((VAR_HIDDEN,), 0.01),
            "ln1_g": jnp.ones((VAR_HIDDEN,), jnp.float32), "ln1_b": jnp.zeros((VAR_HIDDEN,), jnp.float32),
            "conv2_w": w((VAR_KS, VAR_HIDDEN, VAR_HIDDEN)), "conv2_b": w((VAR_HIDDEN,), 0.01),
            "ln2_g": jnp.ones((VAR_HIDDEN,), jnp.float32), "ln2_b": jnp.zeros((VAR_HIDDEN,), jnp.float32),
            "proj_w": w((1, 1, VAR_HIDDEN)), "proj_b": w((1,), 0.01),
        },
        "gen": {
            "conv_pre_w": w((CONV_PRE_K, UPSAMPLE_INIT_CH, MODEL_IN_DIM)),
            "conv_pre_b": w((UPSAMPLE_INIT_CH,), 0.01),
            "ups": [],
            "resblocks": [],
        },
    }
    for i, (u, k) in enumerate(zip(UPSAMPLE_RATES, UPSAMPLE_KSIZES)):
        cin = UPSAMPLE_INIT_CH // (2 ** i)
        cout = UPSAMPLE_INIT_CH // (2 ** (i + 1))
        # torch ConvTranspose1d weight layout (C_in, C_out, K)
        params["gen"]["ups"].append({"w": w((cin, cout, k)), "b": w((cout,), 0.01)})
        ch = cout
        for ks, dils in zip(RESBLOCK_KSIZES, RESBLOCK_DILATIONS):
            rb = {"convs1": [], "convs2": []}
            for d in dils:
                c1 = conv_p(ch, ch, ks); c1["d"] = d
                c2 = conv_p(ch, ch, ks); c2["d"] = 1
                rb["convs1"].append(c1)
                rb["convs2"].append(c2)
            params["gen"]["resblocks"].append(rb)
    last_ch = UPSAMPLE_INIT_CH // (2 ** len(UPSAMPLE_RATES))
    params["gen"]["conv_post_w"] = w((CONV_POST_K, 1, last_ch))
    params["gen"]["conv_post_b"] = w((1,), 0.01)
    return params


# ----------------------------- pure-JAX reference (for the in-script check) ------------
def _ref_conv1d(x, w, b, dilation=1, padding=0):
    K = w.shape[0]
    xp = jnp.pad(x, ((0, 0), (padding, padding)))
    T_out = xp.shape[1] - dilation * (K - 1)
    acc = b[:, None]
    for k in range(K):
        acc = acc + jnp.dot(w[k], xp[:, k * dilation:k * dilation + T_out])
    return acc


def _ref_conv_transpose1d(x, wt, b, stride, padding):
    C_in, C_out, K = wt.shape
    T = x.shape[1]
    xz = jnp.zeros((C_in, (T - 1) * stride + 1), x.dtype).at[:, ::stride].set(x)
    w = jnp.transpose(wt[:, :, ::-1], (2, 1, 0))
    return _ref_conv1d(xz, w, b, dilation=1, padding=K - 1 - padding)


def _ref_lrelu(x):
    return jnp.where(x >= 0, x, LRELU_SLOPE * x)


def _ref_generator(g, x):
    x = _ref_conv1d(x, g["conv_pre_w"], g["conv_pre_b"], padding=(CONV_PRE_K - 1) // 2)
    n_k = len(RESBLOCK_KSIZES)
    for i, (s, K) in enumerate(zip(UPSAMPLE_RATES, UPSAMPLE_KSIZES)):
        x = _ref_lrelu(x)
        x = _ref_conv_transpose1d(x, g["ups"][i]["w"], g["ups"][i]["b"], s, (K - s) // 2)
        xs = None
        for j in range(n_k):
            rb = g["resblocks"][i * n_k + j]
            xr = x
            for c1, c2 in zip(rb["convs1"], rb["convs2"]):
                h = _ref_conv1d(_ref_lrelu(xr), c1["w"], c1["b"], dilation=c1["d"],
                                padding=get_padding(RESBLOCK_KSIZES[j], c1["d"]))
                h = _ref_conv1d(_ref_lrelu(h), c2["w"], c2["b"], dilation=c2["d"],
                                padding=get_padding(RESBLOCK_KSIZES[j], c2["d"]))
                xr = xr + h
            xs = xr if xs is None else xs + xr
        x = xs / n_k
    x = _ref_conv1d(_ref_lrelu(x), g["conv_post_w"], g["conv_post_b"],
                    padding=(CONV_POST_K - 1) // 2)
    return jnp.tanh(x)


# ----------------------------- main -----------------------------------------------------
if __name__ == "__main__":
    key = jax.random.PRNGKey(0)
    pkey, ukey = jax.random.split(key)

    raw_params = init_params(pkey)
    lang_spkr_idx_map = {
        "multilingual": {"eng": 0, "fra": 1, "spa": 2, "deu": 3},
        "multispkr": {"eng": [0, 1], "fra": [2], "spa": [3], "deu": [4]},
    }
    vocoder = Vocoder(raw_params, lang_spkr_idx_map)

    units = jax.random.randint(ukey, (8,), 0, NUM_EMB, dtype=jnp.int32)   # 1D unit sequence
    wav = vocoder(units, "eng", spkr_list=None, dur_prediction=True)
    wav = jax.block_until_ready(wav)

    assert wav.ndim == 3 and wav.shape[0] == 1 and wav.shape[1] == 1
    assert bool(jnp.all(jnp.isfinite(wav)))

    # Cross-check the fused Pallas generator against a pure-JAX reference (same durations).
    code = units.reshape(1, -1)
    dur = vocoder._predict_dur(code[0])
    total = int(jax.device_get(jnp.sum(dur)))
    emb_rep = jnp.repeat(raw_params["dict"][code[0]], dur, axis=0, total_repeat_length=total)
    lang_vec = raw_params["lang"][lang_spkr_idx_map["multilingual"]["eng"]]
    spkr_vec = raw_params["spkr"][lang_spkr_idx_map["multispkr"]["eng"][0]]
    x_full = jnp.concatenate([
        jnp.broadcast_to(lang_vec[:, None], (LANG_EMB, total)),
        emb_rep.T,
        jnp.broadcast_to(spkr_vec[:, None], (SPKR_EMB, total)),
    ], axis=0)
    wav_ref = _ref_generator(raw_params["gen"], x_full)                    # (1, T_wav)
    err = float(jnp.max(jnp.abs(wav[0] - wav_ref)))
    assert err < 2e-3, f"Pallas vs reference mismatch: {err}"

    print("KERNEL_OK")
</pallas_src>

<mosaic_0001>
module attributes {stable_mosaic.version = 11 : i64} {
  func.func @kernel(%arg0: i32, %arg1: memref<32x8xf32, #tpu.memory_space<vmem>>, %arg2: memref<3x16x32xf32, #tpu.memory_space<vmem>>, %arg3: memref<16x1xf32, #tpu.memory_space<vmem>>, %arg4: memref<16x1xf32, #tpu.memory_space<vmem>>, %arg5: memref<16x1xf32, #tpu.memory_space<vmem>>, %arg6: memref<3x16x16xf32, #tpu.memory_space<vmem>>, %arg7: memref<16x1xf32, #tpu.memory_space<vmem>>, %arg8: memref<16x1xf32, #tpu.memory_space<vmem>>, %arg9: memref<16x1xf32, #tpu.memory_space<vmem>>, %arg10: memref<1x1x16xf32, #tpu.memory_space<vmem>>, %arg11: memref<1x1xf32, #tpu.memory_space<vmem>>, %arg12: memref<1x8xf32, #tpu.memory_space<vmem>>, %arg13: memref<32x10xf32, #tpu.memory_space<vmem>>, %arg14: memref<16x10xf32, #tpu.memory_space<vmem>>) attributes {dimension_semantics = [#tpu.dimension_semantics<arbitrary>], iteration_bounds = array<i64: 1>, scalar_prefetch = 0 : i64, scratch_operands = 2 : i64, tpu.core_type = #tpu.core_type<tc>, window_params = [{pipeline_mode = #tpu.pipeline_mode<synchronous>, transform_indices = @transform_0, window_bounds = array<i64: 32, 8>}, {pipeline_mode = #tpu.pipeline_mode<synchronous>, transform_indices = @transform_1, window_bounds = array<i64: 3, 16, 32>}, {pipeline_mode = #tpu.pipeline_mode<synchronous>, transform_indices = @transform_2, window_bounds = array<i64: 16, 1>}, {pipeline_mode = #tpu.pipeline_mode<synchronous>, transform_indices = @transform_3, window_bounds = array<i64: 16, 1>}, {pipeline_mode = #tpu.pipeline_mode<synchronous>, transform_indices = @transform_4, window_bounds = array<i64: 16, 1>}, {pipeline_mode = #tpu.pipeline_mode<synchronous>, transform_indices = @transform_5, window_bounds = array<i64: 3, 16, 16>}, {pipeline_mode = #tpu.pipeline_mode<synchronous>, transform_indices = @transform_6, window_bounds = array<i64: 16, 1>}, {pipeline_mode = #tpu.pipeline_mode<synchronous>, transform_indices = @transform_7, window_bounds = array<i64: 16, 1>}, {pipeline_mode = #tpu.pipeline_mode<synchronous>, transform_indices = @transform_8, window_bounds = array<i64: 16, 1>}, {pipeline_mode = #tpu.pipeline_mode<synchronous>, transform_indices = @transform_9, window_bounds = array<i64: 1, 1, 16>}, {pipeline_mode = #tpu.pipeline_mode<synchronous>, transform_indices = @transform_10, window_bounds = array<i64: 1, 1>}, {pipeline_mode = #tpu.pipeline_mode<synchronous>, transform_indices = @transform_11, window_bounds = array<i64: 1, 8>}]} {
    %c0 = arith.constant 0 : index
    %c0_0 = arith.constant 0 : index
    %0 = vector.load %arg1[%c0, %c0_0] : memref<32x8xf32, #tpu.memory_space<vmem>>, vector<32x8xf32>
    %cst = arith.constant 0.000000e+00 : f32
    %1 = vector.broadcast %cst : f32 to vector<32x10xf32>
    %c0_1 = arith.constant 0 : index
    %c0_2 = arith.constant 0 : index
    %2 = vector.load %arg13[%c0_1, %c0_2] : memref<32x10xf32, #tpu.memory_space<vmem>>, vector<32x10xf32>
    tpu.vector_store %arg13[%c0_1, %c0_2], %1 {strides = array<i32>} : memref<32x10xf32, #tpu.memory_space<vmem>>, vector<32x10xf32>,
    %c0_3 = arith.constant 0 : index
    %c1 = arith.constant 1 : index
    %3 = vector.load %arg13[%c0_3, %c1] : memref<32x10xf32, #tpu.memory_space<vmem>>, vector<32x8xf32>
    tpu.vector_store %arg13[%c0_3, %c1], %0 {strides = array<i32>} : memref<32x10xf32, #tpu.memory_space<vmem>>, vector<32x8xf32>,
    %c0_4 = arith.constant 0 : index
    %c0_5 = arith.constant 0 : index
    %c0_6 = arith.constant 0 : index
    %4 = vector.load %arg2[%c0_4, %c0_5, %c0_6] : memref<3x16x32xf32, #tpu.memory_space<vmem>>, vector<1x16x32xf32>
    %5 = vector.shape_cast %4 : vector<1x16x32xf32> to vector<16x32xf32>
    %c0_7 = arith.constant 0 : index
    %c0_8 = arith.constant 0 : index
    %6 = vector.load %arg13[%c0_7, %c0_8] : memref<32x10xf32, #tpu.memory_space<vmem>>, vector<32x8xf32>
    %cst_9 = arith.constant dense<0.000000e+00> : vector<16x8xf32>
    %7 = tpu.matmul %5, %6, %cst_9 {dimension_numbers = #tpu.dot_dimension_numbers<[1], [0], [0], [1], [0, 0, 1, 1], [], []>} : vector<16x32xf32>, vector<32x8xf32>, vector<16x8xf32> -> vector<16x8xf32>
    %c1_10 = arith.constant 1 : index
    %c0_11 = arith.constant 0 : index
    %c0_12 = arith.constant 0 : index
    %8 = vector.load %arg2[%c1_10, %c0_11, %c0_12] : memref<3x16x32xf32, #tpu.memory_space<vmem>>, vector<1x16x32xf32>
    %9 = vector.shape_cast %8 : vector<1x16x32xf32> to vector<16x32xf32>
    %c0_13 = arith.constant 0 : index
    %c1_14 = arith.constant 1 : index
    %10 = vector.load %arg13[%c0_13, %c1_14] : memref<32x10xf32, #tpu.memory_space<vmem>>, vector<32x8xf32>
    %cst_15 = arith.constant dense<0.000000e+00> : vector<16x8xf32>
    %11 = tpu.matmul %9, %10, %cst_15 {dimension_numbers = #tpu.dot_dimension_numbers<[1], [0], [0], [1], [0, 0, 1, 1], [], []>} : vector<16x32xf32>, vector<32x8xf32>, vector<16x8xf32> -> vector<16x8xf32>
    %12 = arith.addf %7, %11 : vector<16x8xf32>
    %c2 = arith.constant 2 : index
    %c0_16 = arith.constant 0 : index
    %c0_17 = arith.constant 0 : index
    %13 = vector.load %arg2[%c2, %c0_16, %c0_17] : memref<3x16x32xf32, #tpu.memory_space<vmem>>, vector<1x16x32xf32>
    %14 = vector.shape_cast %13 : vector<1x16x32xf32> to vector<16x32xf32>
    %c0_18 = arith.constant 0 : index
    %c2_19 = arith.constant 2 : index
    %15 = vector.load %arg13[%c0_18, %c2_19] : memref<32x10xf32, #tpu.memory_space<vmem>>, vector<32x8xf32>
    %cst_20 = arith.constant dense<0.000000e+00> : vector<16x8xf32>
    %16 = tpu.matmul %14, %15, %cst_20 {dimension_numbers = #tpu.dot_dimension_numbers<[1], [0], [0], [1], [0, 0, 1, 1], [], []>} : vector<16x32xf32>, vector<32x8xf32>, vector<16x8xf32> -> vector<16x8xf32>
    %17 = arith.addf %12, %16 : vector<16x8xf32>
    %c0_21 = arith.constant 0 : index
    %c0_22 = arith.constant 0 : index
    %18 = vector.load %arg3[%c0_21, %c0_22] : memref<16x1xf32, #tpu.memory_space<vmem>>, vector<16x1xf32>
    %19 = vector.broadcast %18 : vector<16x1xf32> to vector<16x8xf32>
    %20 = arith.addf %17, %19 : vector<16x8xf32>
    %cst_23 = arith.constant 0.000000e+00 : f32
    %21 = vector.broadcast %cst_23 : f32 to vector<16x8xf32>
    %22 = arith.maximumf %20, %21 : vector<16x8xf32>
    %cst_24 = arith.constant dense<0.000000e+00> : vector<8xf32>
    %23 = vector.multi_reduction <add>, %22, %cst_24 [0] : vector<16x8xf32> to vector<8xf32>
    %24 = vector.shape_cast %23 : vector<8xf32> to vector<1x8xf32>
    %cst_25 = arith.constant 1.600000e+01 : f32
    %25 = vector.broadcast %cst_25 : f32 to vector<1x8xf32>
    %26 = arith.divf %24, %25 : vector<1x8xf32>
    %27 = vector.broadcast %26 : vector<1x8xf32> to vector<16x8xf32>
    %28 = arith.subf %22, %27 : vector<16x8xf32>
    %29 = arith.mulf %28, %28 : vector<16x8xf32>
    %cst_26 = arith.constant dense<0.000000e+00> : vector<8xf32>
    %30 = vector.multi_reduction <add>, %29, %cst_26 [0] : vector<16x8xf32> to vector<8xf32>
    %31 = vector.shape_cast %30 : vector<8xf32> to vector<1x8xf32>
    %cst_27 = arith.constant 1.600000e+01 : f32
    %32 = vector.broadcast %cst_27 : f32 to vector<1x8xf32>
    %33 = arith.divf %31, %32 : vector<1x8xf32>
    %34 = vector.broadcast %26 : vector<1x8xf32> to vector<16x8xf32>
    %35 = arith.subf %22, %34 : vector<16x8xf32>
    %cst_28 = arith.constant 9.99999974E-6 : f32
    %36 = vector.broadcast %cst_28 : f32 to vector<1x8xf32>
    %37 = arith.addf %33, %36 : vector<1x8xf32>
    %38 = math.rsqrt %37 : vector<1x8xf32>
    %39 = vector.broadcast %38 : vector<1x8xf32> to vector<16x8xf32>
    %40 = arith.mulf %35, %39 : vector<16x8xf32>
    %c0_29 = arith.constant 0 : index
    %c0_30 = arith.constant 0 : index
    %41 = vector.load %arg4[%c0_29, %c0_30] : memref<16x1xf32, #tpu.memory_space<vmem>>, vector<16x1xf32>
    %42 = vector.broadcast %41 : vector<16x1xf32> to vector<16x8xf32>
    %43 = arith.mulf %40, %42 : vector<16x8xf32>
    %c0_31 = arith.constant 0 : index
    %c0_32 = arith.constant 0 : index
    %44 = vector.load %arg5[%c0_31, %c0_32] : memref<16x1xf32, #tpu.memory_space<vmem>>, vector<16x1xf32>
    %45 = vector.broadcast %44 : vector<16x1xf32> to vector<16x8xf32>
    %46 = arith.addf %43, %45 : vector<16x8xf32>
    %cst_33 = arith.constant 0.000000e+00 : f32
    %47 = vector.broadcast %cst_33 : f32 to vector<16x10xf32>
    %c0_34 = arith.constant 0 : index
    %c0_35 = arith.constant 0 : index
    %48 = vector.load %arg14[%c0_34, %c0_35] : memref<16x10xf32, #tpu.memory_space<vmem>>, vector<16x10xf32>
    tpu.vector_store %arg14[%c0_34, %c0_35], %47 {strides = array<i32>} : memref<16x10xf32, #tpu.memory_space<vmem>>, vector<16x10xf32>,
    %c0_36 = arith.constant 0 : index
    %c1_37 = arith.constant 1 : index
    %49 = vector.load %arg14[%c0_36, %c1_37] : memref<16x10xf32, #tpu.memory_space<vmem>>, vector<16x8xf32>
    tpu.vector_store %arg14[%c0_36, %c1_37], %46 {strides = array<i32>} : memref<16x10xf32, #tpu.memory_space<vmem>>, vector<16x8xf32>,
    %c0_38 = arith.constant 0 : index
    %c0_39 = arith.constant 0 : index
    %c0_40 = arith.constant 0 : index
    %50 = vector.load %arg6[%c0_38, %c0_39, %c0_40] : memref<3x16x16xf32, #tpu.memory_space<vmem>>, vector<1x16x16xf32>
    %51 = vector.shape_cast %50 : vector<1x16x16xf32> to vector<16x16xf32>
    %c0_41 = arith.constant 0 : index
    %c0_42 = arith.constant 0 : index
    %52 = vector.load %arg14[%c0_41, %c0_42] : memref<16x10xf32, #tpu.memory_space<vmem>>, vector<16x8xf32>
    %cst_43 = arith.constant dense<0.000000e+00> : vector<16x8xf32>
    %53 = tpu.matmul %51, %52, %cst_43 {dimension_numbers = #tpu.dot_dimension_numbers<[1], [0], [0], [1], [0, 0, 1, 1], [], []>} : vector<16x16xf32>, vector<16x8xf32>, vector<16x8xf32> -> vector<16x8xf32>
    %c1_44 = arith.constant 1 : index
    %c0_45 = arith.constant 0 : index
    %c0_46 = arith.constant 0 : index
    %54 = vector.load %arg6[%c1_44, %c0_45, %c0_46] : memref<3x16x16xf32, #tpu.memory_space<vmem>>, vector<1x16x16xf32>
    %55 = vector.shape_cast %54 : vector<1x16x16xf32> to vector<16x16xf32>
    %c0_47 = arith.constant 0 : index
    %c1_48 = arith.constant 1 : index
    %56 = vector.load %arg14[%c0_47, %c1_48] : memref<16x10xf32, #tpu.memory_space<vmem>>, vector<16x8xf32>
    %cst_49 = arith.constant dense<0.000000e+00> : vector<16x8xf32>
    %57 = tpu.matmul %55, %56, %cst_49 {dimension_numbers = #tpu.dot_dimension_numbers<[1], [0], [0], [1], [0, 0, 1, 1], [], []>} : vector<16x16xf32>, vector<16x8xf32>, vector<16x8xf32> -> vector<16x8xf32>
    %58 = arith.addf %53, %57 : vector<16x8xf32>
    %c2_50 = arith.constant 2 : index
    %c0_51 = arith.constant 0 : index
    %c0_52 = arith.constant 0 : index
    %59 = vector.load %arg6[%c2_50, %c0_51, %c0_52] : memref<3x16x16xf32, #tpu.memory_space<vmem>>, vector<1x16x16xf32>
    %60 = vector.shape_cast %59 : vector<1x16x16xf32> to vector<16x16xf32>
    %c0_53 = arith.constant 0 : index
    %c2_54 = arith.constant 2 : index
    %61 = vector.load %arg14[%c0_53, %c2_54] : memref<16x10xf32, #tpu.memory_space<vmem>>, vector<16x8xf32>
    %cst_55 = arith.constant dense<0.000000e+00> : vector<16x8xf32>
    %62 = tpu.matmul %60, %61, %cst_55 {dimension_numbers = #tpu.dot_dimension_numbers<[1], [0], [0], [1], [0, 0, 1, 1], [], []>} : vector<16x16xf32>, vector<16x8xf32>, vector<16x8xf32> -> vector<16x8xf32>
    %63 = arith.addf %58, %62 : vector<16x8xf32>
    %c0_56 = arith.constant 0 : index
    %c0_57 = arith.constant 0 : index
    %64 = vector.load %arg7[%c0_56, %c0_57] : memref<16x1xf32, #tpu.memory_space<vmem>>, vector<16x1xf32>
    %65 = vector.broadcast %64 : vector<16x1xf32> to vector<16x8xf32>
    %66 = arith.addf %63, %65 : vector<16x8xf32>
    %cst_58 = arith.constant 0.000000e+00 : f32
    %67 = vector.broadcast %cst_58 : f32 to vector<16x8xf32>
    %68 = arith.maximumf %66, %67 : vector<16x8xf32>
    %cst_59 = arith.constant dense<0.000000e+00> : vector<8xf32>
    %69 = vector.multi_reduction <add>, %68, %cst_59 [0] : vector<16x8xf32> to vector<8xf32>
    %70 = vector.shape_cast %69 : vector<8xf32> to vector<1x8xf32>
    %cst_60 = arith.constant 1.600000e+01 : f32
    %71 = vector.broadcast %cst_60 : f32 to vector<1x8xf32>
    %72 = arith.divf %70, %71 : vector<1x8xf32>
    %73 = vector.broadcast %72 : vector<1x8xf32> to vector<16x8xf32>
    %74 = arith.subf %68, %73 : vector<16x8xf32>
    %75 = arith.mulf %74, %74 : vector<16x8xf32>
    %cst_61 = arith.constant dense<0.000000e+00> : vector<8xf32>
    %76 = vector.multi_reduction <add>, %75, %cst_61 [0] : vector<16x8xf32> to vector<8xf32>
    %77 = vector.shape_cast %76 : vector<8xf32> to vector<1x8xf32>
    %cst_62 = arith.constant 1.600000e+01 : f32
    %78 = vector.broadcast %cst_62 : f32 to vector<1x8xf32>
    %79 = arith.divf %77, %78 : vector<1x8xf32>
    %80 = vector.broadcast %72 : vector<1x8xf32> to vector<16x8xf32>
    %81 = arith.subf %68, %80 : vector<16x8xf32>
    %cst_63 = arith.constant 9.99999974E-6 : f32
    %82 = vector.broadcast %cst_63 : f32 to vector<1x8xf32>
    %83 = arith.addf %79, %82 : vector<1x8xf32>
    %84 = math.rsqrt %83 : vector<1x8xf32>
    %85 = vector.broadcast %84 : vector<1x8xf32> to vector<16x8xf32>
    %86 = arith.mulf %81, %85 : vector<16x8xf32>
    %c0_64 = arith.constant 0 : index
    %c0_65 = arith.constant 0 : index
    %87 = vector.load %arg8[%c0_64, %c0_65] : memref<16x1xf32, #tpu.memory_space<vmem>>, vector<16x1xf32>
    %88 = vector.broadcast %87 : vector<16x1xf32> to vector<16x8xf32>
    %89 = arith.mulf %86, %88 : vector<16x8xf32>
    %c0_66 = arith.constant 0 : index
    %c0_67 = arith.constant 0 : index
    %90 = vector.load %arg9[%c0_66, %c0_67] : memref<16x1xf32, #tpu.memory_space<vmem>>, vector<16x1xf32>
    %91 = vector.broadcast %90 : vector<16x1xf32> to vector<16x8xf32>
    %92 = arith.addf %89, %91 : vector<16x8xf32>
    %c0_68 = arith.constant 0 : index
    %c0_69 = arith.constant 0 : index
    %c0_70 = arith.constant 0 : index
    %93 = vector.load %arg10[%c0_68, %c0_69, %c0_70] : memref<1x1x16xf32, #tpu.memory_space<vmem>>, vector<1x1x16xf32>
    %94 = vector.shape_cast %93 : vector<1x1x16xf32> to vector<1x16xf32>
    %cst_71 = arith.constant dense<0.000000e+00> : vector<1x8xf32>
    %95 = tpu.matmul %94, %92, %cst_71 {dimension_numbers = #tpu.dot_dimension_numbers<[1], [0], [0], [1], [0, 0, 1, 1], [], []>} : vector<1x16xf32>, vector<16x8xf32>, vector<1x8xf32> -> vector<1x8xf32>
    %c0_72 = arith.constant 0 : index
    %c0_73 = arith.constant 0 : index
    %96 = vector.load %arg11[%c0_72, %c0_73] : memref<1x1xf32, #tpu.memory_space<vmem>>, vector<1x1xf32>
    %97 = vector.broadcast %96 : vector<1x1xf32> to vector<1x8xf32>
    %98 = arith.addf %95, %97 : vector<1x8xf32>
    %c0_74 = arith.constant 0 : index
    %c0_75 = arith.constant 0 : index
    %99 = vector.load %arg12[%c0_74, %c0_75] : memref<1x8xf32, #tpu.memory_space<vmem>>, vector<1x8xf32>
    tpu.vector_store %arg12[%c0_74, %c0_75], %98 {strides = array<i32>} : memref<1x8xf32, #tpu.memory_space<vmem>>, vector<1x8xf32>,
    return
  }
  func.func @transform_0(%arg0: i32) -> (i32, i32) {
    %c0_i32 = arith.constant 0 : i32
    %c0_i32_0 = arith.constant 0 : i32
    %c0_i32_1 = arith.constant 0 : i32
    return %c0_i32, %c0_i32_0 : i32, i32
  }
  func.func @transform_1(%arg0: i32) -> (i32, i32, i32) {
    %c0_i32 = arith.constant 0 : i32
    %c0_i32_0 = arith.constant 0 : i32
    %c0_i32_1 = arith.constant 0 : i32
    %c0_i32_2 = arith.constant 0 : i32
    return %c0_i32, %c0_i32_0, %c0_i32_1 : i32, i32, i32
  }
  func.func @transform_2(%arg0: i32) -> (i32, i32) {
    %c0_i32 = arith.constant 0 : i32
    %c0_i32_0 = arith.constant 0 : i32
    %c0_i32_1 = arith.constant 0 : i32
    return %c0_i32, %c0_i32_0 : i32, i32
  }
  func.func @transform_3(%arg0: i32) -> (i32, i32) {
    %c0_i32 = arith.constant 0 : i32
    %c0_i32_0 = arith.constant 0 : i32
    %c0_i32_1 = arith.constant 0 : i32
    return %c0_i32, %c0_i32_0 : i32, i32
  }
  func.func @transform_4(%arg0: i32) -> (i32, i32) {
    %c0_i32 = arith.constant 0 : i32
    %c0_i32_0 = arith.constant 0 : i32
    %c0_i32_1 = arith.constant 0 : i32
    return %c0_i32, %c0_i32_0 : i32, i32
  }
  func.func @transform_5(%arg0: i32) -> (i32, i32, i32) {
    %c0_i32 = arith.constant 0 : i32
    %c0_i32_0 = arith.constant 0 : i32
    %c0_i32_1 = arith.constant 0 : i32
    %c0_i32_2 = arith.constant 0 : i32
    return %c0_i32, %c0_i32_0, %c0_i32_1 : i32, i32, i32
  }
  func.func @transform_6(%arg0: i32) -> (i32, i32) {
    %c0_i32 = arith.constant 0 : i32
    %c0_i32_0 = arith.constant 0 : i32
    %c0_i32_1 = arith.constant 0 : i32
    return %c0_i32, %c0_i32_0 : i32, i32
  }
  func.func @transform_7(%arg0: i32) -> (i32, i32) {
    %c0_i32 = arith.constant 0 : i32
    %c0_i32_0 = arith.constant 0 : i32
    %c0_i32_1 = arith.constant 0 : i32
    return %c0_i32, %c0_i32_0 : i32, i32
  }
  func.func @transform_8(%arg0: i32) -> (i32, i32) {
    %c0_i32 = arith.constant 0 : i32
    %c0_i32_0 = arith.constant 0 : i32
    %c0_i32_1 = arith.constant 0 : i32
    return %c0_i32, %c0_i32_0 : i32, i32
  }
  func.func @transform_9(%arg0: i32) -> (i32, i32, i32) {
    %c0_i32 = arith.constant 0 : i32
    %c0_i32_0 = arith.constant 0 : i32
    %c0_i32_1 = arith.constant 0 : i32
    %c0_i32_2 = arith.constant 0 : i32
    return %c0_i32, %c0_i32_0, %c0_i32_1 : i32, i32, i32
  }
  func.func @transform_10(%arg0: i32) -> (i32, i32) {
    %c0_i32 = arith.constant 0 : i32
    %c0_i32_0 = arith.constant 0 : i32
    %c0_i32_1 = arith.constant 0 : i32
    return %c0_i32, %c0_i32_0 : i32, i32
  }
  func.func @transform_11(%arg0: i32) -> (i32, i32) {
    %c0_i32 = arith.constant 0 : i32
    %c0_i32_0 = arith.constant 0 : i32
    %c0_i32_1 = arith.constant 0 : i32
    return %c0_i32, %c0_i32_0 : i32, i32
  }
}

</mosaic_0001>

<bundles_post_ra>
// kernel: _lambda_.1
= control target key start
LH: loop header
LB: loop body
LE: loop exit
PB: predicated region body
PF: predicated region fallthrough
CT: control target
= control target key end

     0   :  { %vm44_vm0 = vcmask 80896   ;;  %v1001_v2 = vmov 0.0   ;;  %s1002_s21 = smov 1   ;;  %vm65_vm1 = vcmask 72712   ;;  %vm95_vm2 = vcmask 261120   ;;  %s1003_s29 = smov 127   ;;  %s1214_s0 = inlined_call_operand.vmem [shape: f32[32,8], index: 0, kind: input, shape index: {}]   ;;  %s1215_s1 = inlined_call_operand.vmem [shape: f32[3,16,32], index: 1, kind: input, shape index: {}]   ;;  %s1216_s2 = inlined_call_operand.vmem [shape: f32[16,1], index: 2, kind: input, shape index: {}]   ;;  %s1217_s3 = inlined_call_operand.vmem [shape: f32[16,1], index: 3, kind: input, shape index: {}, may-alias: {3,7}]   ;;  %s1218_s4 = inlined_call_operand.vmem [shape: f32[16,1], index: 4, kind: input, shape index: {}, may-alias: {4,8}]   ;;  %s1219_s10 = inlined_call_operand.<no memory space> [shape: f32[1,1], index: 10, kind: input, shape index: {}]   ;;  %s1220_s5 = inlined_call_operand.vmem [shape: f32[3,16,16], index: 5, kind: input, shape index: {}]   ;;  %s1221_s6 = inlined_call_operand.vmem [shape: f32[16,1], index: 6, kind: input, shape index: {}]   ;;  %s1222_s7 = inlined_call_operand.vmem [shape: f32[16,1], index: 7, kind: input, shape index: {}, may-alias: {3,7}]   ;;  %s1223_s8 = inlined_call_operand.vmem [shape: f32[16,1], index: 8, kind: input, shape index: {}, may-alias: {4,8}]   ;;  %s1224_s9 = inlined_call_operand.vmem [shape: f32[1,1,16], index: 9, kind: input, shape index: {}]   ;;  %s1225_s11 = inlined_call_operand.vmem [shape: f32[1,8], index: 11, kind: output, shape index: {}]  }
   0x1   :  { %v43_v0 = vld [vmem:[%s1214_s0 + $0x18] sm:$0xff]  ;;  %v41_v1 = vld [vmem:[%s1214_s0 + $0x8] sm:$0xff]  ;;  %48 = vst.msk [vmem:[#allocation2 + $0x18] sm:$0xff] %vm44_vm0, %v1001_v2  ;;  %45 = vst.msk [vmem:[#allocation2] sm:$0xff] %vm44_vm0, %v1001_v2  ;;  %v1004_v16 = vmov 0   ;;  %s1005_s13 = smov 126  }
   0x2   :  { %46 = vst.msk [vmem:[#allocation2 + $0x8] sm:$0xff] %vm44_vm0, %v1001_v2  ;;  %47 = vst.msk [vmem:[#allocation2 + $0x10] sm:$0xff] %vm44_vm0, %v1001_v2  ;;  %59 = vrot.lane.b32.xlu0 %v43_v0, %s1002_s21  ;;  %55 = vrot.lane.b32.xlu1 %v41_v1, %s1002_s21  ;;  %v42_v3 = vld [vmem:[%s1214_s0 + $0x10] sm:$0xff]  ;;  %v40_v4 = vld [vmem:[%s1214_s0] sm:$0xff]  ;;  %vm372_vm3 = vcmask 64512   ;;  %vm457_vm4 = vcmask 130048  }
   0x3   :  { %430 = vst.msk [vmem:[#allocation3] sm:$0xff] %vm44_vm0, %v1001_v2  ;;  %431 = vst.msk [vmem:[#allocation3 + $0x8] sm:$0xff] %vm44_vm0, %v1001_v2  ;;  %v874_v9 = vld [vmem:[%s1215_s1 + $0x10] sm:$0xff]  ;;  %v70_v10 = vld [vmem:[%s1215_s1] sm:$0xff]  ;;  %996 = vset.pattern.permute.xlu1 %v1004_v16  ;;  %995 = vset.pattern.permute.xlu0 %v1004_v16  ;;  %vm1006_vm5 = vmmov 0   ;;  %vm868_vm6 = vcmask 57344  }
   0x4   :  { %936 = vmatprep.mubr.msk.f32.mxu0 %vm95_vm2, %v874_v9  ;;  %947 = vmatprep.mubr.msk.f32.mxu1 %vm95_vm2, %v70_v10  ;;  %v71_v15 = vld [vmem:[%s1215_s1 + $0x8] sm:$0xff]  ;;  %v356_v17 = vld [vmem:[%s1216_s2] sm:$0xff]  ;;  %v875_v28 = vld [vmem:[%s1215_s1 + $0x18] sm:$0xff] }
   0x5   :  { %v402_v18 = vld [vmem:[%s1217_s3] sm:$0xff]  ;;  %v357_v19 = vld [vmem:[%s1216_s2 + $0x8] sm:$0xff] }
   0x6   :  { %57 = vrot.lane.b32.xlu0 %v42_v3, %s1002_s21  ;;  %53 = vrot.lane.b32.xlu1 %v40_v4, %s1002_s21  ;;  %v416_v20 = vld [vmem:[%s1218_s4] sm:$0xff]  ;;  %v403_v21 = vld [vmem:[%s1217_s3 + $0x8] sm:$0xff] }
   0x7   :  { %v417_v22 = vld [vmem:[%s1218_s4 + $0x8] sm:$0xff]  ;;  %v880_v29 = vld [vmem:[%s1215_s1 + $0x20] sm:$0xff] }
   0x8   :  { %v881_v33 = vld [vmem:[%s1215_s1 + $0x28] sm:$0xff] }
  0x74   :  { %v60_v5 = vpop.permute.xlu0 %59  ;;  %v56_v6 = vpop.permute.xlu1 %55 }
  0x75   :  { %69 = vst.msk [vmem:[#allocation2 + $0x18] sm:$0xff] %vm65_vm1, %v60_v5  ;;  %67 = vst.msk [vmem:[#allocation2 + $0x8] sm:$0xff] %vm65_vm1, %v56_v6 }
  0x78   :  { %v58_v7 = vpop.permute.xlu0 %57  ;;  %v54_v8 = vpop.permute.xlu1 %53 }
  0x79   :  { %68 = vst.msk [vmem:[#allocation2 + $0x10] sm:$0xff] %vm65_vm1, %v58_v7  ;;  %66 = vst.msk [vmem:[#allocation2] sm:$0xff] %vm65_vm1, %v54_v8 }
  0x7c   :  { %v75_v11 = vld [vmem:[#allocation2 + $0x18] sm:$0xff]  ;;  %v73_v12 = vld [vmem:[#allocation2 + $0x8] sm:$0xff] }
  0x7d   :  { %939 = vmatprep.subr.mxu1 %v75_v11  ;;  %89 = vrot.lane.b32.xlu0 %v75_v11, %s1003_s29 }
  0x7e   :  { %940 = vmatpush3.msra.mxu1 %v75_v11 }
  0x80   :  { %v74_v13 = vld [vmem:[#allocation2 + $0x10] sm:$0xff]  ;;  %v72_v14 = vld [vmem:[#allocation2] sm:$0xff] }
  0x81   :  { %941 = vmatprep.subr.mxu1 %v74_v13  ;;  %85 = vrot.lane.b32.xlu0 %v73_v12, %s1003_s29 }
  0x82   :  { %87 = vrot.lane.b32.xlu1 %v74_v13, %s1003_s29  ;;  %942 = vmatpush3.msra.mxu1 %v74_v13 }
  0x83   :  { %943 = vmatprep.subr.mxu1 %v73_v12 }
  0x84   :  { %944 = vmatpush3.msra.mxu1 %v73_v12 }
  0x85   :  { %267 = vrot.lane.b32.xlu0 %v75_v11, %s1005_s13  ;;  %945 = vmatprep.subr.mxu1 %v72_v14 }
  0x86   :  { %83 = vrot.lane.b32.xlu1 %v72_v14, %s1003_s29  ;;  %946 = vmatpush3.msra.mxu1 %v72_v14 }
  0x87   :  { %948 = vmatmul.mubr.msk.f32.vlgmr.msra.gmra.mxu1 %vm95_vm2, %v71_v15 }
  0x89   :  { %263 = vrot.lane.b32.xlu0 %v73_v12, %s1005_s13 }
  0x8a   :  { %265 = vrot.lane.b32.xlu1 %v74_v13, %s1005_s13 }
  0x8d   :  { %360 = vperm.xlu0 %995, %v356_v17  }
  0x8e   :  { %261 = vrot.lane.b32.xlu1 %v72_v14, %s1005_s13 }
  0x91   :  { %406 = vperm.xlu0 %995, %v402_v18  }
  0x92   :  { %365 = vperm.xlu1 %996, %v357_v19  }
  0x95   :  { %420 = vperm.xlu0 %995, %v416_v20  }
  0x96   :  { %411 = vperm.xlu1 %996, %v403_v21  }
  0x9a   :  { %425 = vperm.xlu1 %996, %v417_v22  }
  0xef   :  { %v90_v23 = vpop.permute.xlu0 %89 }
  0xf0   :  { %928 = vmatprep.subr.mxu0 %v90_v23 }
  0xf1   :  { %929 = vmatpush3.msra.mxu0 %v90_v23  ;;  %v16_v23 = vstv %s1219_s10 }
  0xf2   :  { %17 = vst [vmem:[#allocation4] sm:$0x1] %v16_v23 }
  0xf3   :  { %v86_v24 = vpop.permute.xlu0 %85 }
  0xf4   :  { %v88_v25 = vpop.permute.xlu1 %87 }
  0xf5   :  { %930 = vmatprep.subr.mxu0 %v88_v25 }
  0xf6   :  { %931 = vmatpush3.msra.mxu0 %v88_v25 }
  0xf7   :  { %932 = vmatprep.subr.mxu0 %v86_v24  ;;  %v268_v26 = vpop.permute.xlu0 %267 }
  0xf8   :  { %933 = vmatpush3.msra.mxu0 %v86_v24  ;;  %v84_v27 = vpop.permute.xlu1 %83  ;;  %v884_v24 = vld [vmem:[%s1220_s5 + $0x10] sm:$0xff] }
  0xf9   :  { %934 = vmatprep.subr.mxu0 %v84_v27  ;;  %965 = vmatprep.mubr.msk.f32.mxu1 %vm457_vm4, %v884_v24 }
  0xfa   :  { %935 = vmatpush3.msra.mxu0 %v84_v27  ;;  %v890_v27 = vld [vmem:[%s1220_s5 + $0x20] sm:$0xff] }
  0xfb   :  { %937 = vmatmul.mubr.msk.f32.vlgmr.msra.gmra.mxu0 %vm95_vm2, %v875_v28  ;;  %950 = vmatprep.subr.mxu0 %v268_v26  ;;  %v264_v31 = vpop.permute.xlu0 %263 }
  0xfc   :  { %951 = vmatpush3.msra.mxu0 %v268_v26  ;;  %v266_v30 = vpop.permute.xlu1 %265  ;;  %958 = vmatprep.mubr.msk.f32.mxu0 %vm95_vm2, %v880_v29 }
  0xfd   :  { %952 = vmatprep.subr.mxu0 %v266_v30 }
  0xfe   :  { %953 = vmatpush3.msra.mxu0 %v266_v30  ;;  %v713_v30 = vld [vmem:[%s1221_s6 + $0x8] sm:$0xff] }
  0xff   :  { %954 = vmatprep.subr.mxu0 %v264_v31 }
 0x100   :  { %955 = vmatpush3.msra.mxu0 %v264_v31  ;;  %v262_v32 = vpop.permute.xlu1 %261  ;;  %v712_v31 = vld [vmem:[%s1221_s6] sm:$0xff] }
 0x101   :  { %956 = vmatprep.subr.mxu0 %v262_v32 }
 0x102   :  { %957 = vmatpush3.msra.mxu0 %v262_v32  ;;  %v756_v32 = vld [vmem:[%s1222_s7] sm:$0xff] }
 0x103   :  { %959 = vmatmul.mubr.msk.f32.vlgmr.msra.gmra.mxu0 %vm95_vm2, %v881_v33  ;;  %v757_v33 = vld [vmem:[%s1222_s7 + $0x8] sm:$0xff] }
 0x104   :  { %979 = vmatprep.mubr.msk.f32.mxu0 %vm457_vm4, %v890_v27 }
 0x108   :  { %v361_v46 = vpop.permute.xlu0 %360 }
 0x10c   :  { %v407_v12 = vpop.permute.xlu0 %406 }
 0x10d   :  { %v366_v42 = vpop.permute.xlu1 %365 }
 0x110   :  { %v421_v19 = vpop.permute.xlu0 %420 }
 0x111   :  { %v412_v13 = vpop.permute.xlu1 %411 }
 0x115   :  { %v426_v20 = vpop.permute.xlu1 %425 }
 0x147   :  { %v949_v35 = vpop.f32.mrf.mxu1 }
 0x149   :  { %v249_v37 = vpop.f32.mrf.mxu1 }
 0x1bb   :  { %v938_v34 = vpop.f32.mrf.mxu0 }
 0x1bc   :  { %v255_v38 = vadd.f32 %v949_v35, %v938_v34  ;;  %v770_v34 = vld [vmem:[%s1223_s8] sm:$0xff]  ;;  %v771_v35 = vld [vmem:[%s1223_s8 + $0x8] sm:$0xff] }
 0x1bd   :  { %v168_v36 = vpop.f32.mrf.mxu0 }
 0x1be   :  { %v250_v40 = vadd.f32 %v249_v37, %v168_v36  ;;  %v785_v36 = vld [vmem:[#allocation4] sm:$0x1] }
 0x1c3   :  { %v960_v39 = vpop.f32.mrf.mxu0 }
 0x1c4   :  { %v355_v41 = vadd.f32 %v960_v39, %v255_v38  ;;  %v885_v39 = vld [vmem:[%s1220_s5 + $0x18] sm:$0xff] }
 0x1c5   :  { %v345_v43 = vpop.f32.mrf.mxu0 }
 0x1c6   :  { %v369_v44 = vadd.f32 %v366_v42, %v355_v41  ;;  %v354_v45 = vadd.f32 %v345_v43, %v250_v40  ;;  %v442_v41 = vld [vmem:[%s1220_s5] sm:$0xff]  ;;  %v443_v43 = vld [vmem:[%s1220_s5 + $0x8] sm:$0xff] }
 0x1c8   :  { %v371_v47 = vmax.f32 %v369_v44, 0.0  ;;  %v368_v48 = vadd.f32 %v361_v46, %v354_v45  ;;  %v891_v44 = vld [vmem:[%s1220_s5 + $0x28] sm:$0xff] }
 0x1ca   :  { %v370_v49 = vmax.f32 %v368_v48, 0.0  ;;  %v374_v50 = vsel %vm372_vm3, %v371_v47, 0.0 }
 0x1cc   :  { %v373_v51 = vsel %vm372_vm3, %v370_v49, 0.0 }
 0x1cd   :  { %v375_v52 = vadd.f32 %v374_v50, %v373_v51 }
 0x1cf   :  { %v376_v53 = vrot.slane %v375_v52, 4 }
 0x1d1   :  { %v377_v54 = vadd.f32 %v376_v53, %v375_v52 }
 0x1d3   :  { %v378_v55 = vrot.slane %v377_v54, 2 }
 0x1d5   :  { %v379_v56 = vadd.f32 %v378_v55, %v377_v54 }
 0x1d7   :  { %v380_v57 = vrot.slane %v379_v56, 1 }
 0x1d9   :  { %v381_v58 = vadd.f32 %v380_v57, %v379_v56 }
 0x1db   :  { %v383_v59 = vmul.f32 0.0625, %v381_v58 }
 0x1dd   :  { %v384_v60 = vsub.f32 %v370_v49, %v383_v59  ;;  %v385_v61 = vsub.f32 %v371_v47, %v383_v59 }
 0x1df   :  { %v386_v62 = vmul.f32 %v384_v60, %v384_v60  ;;  %v387_v63 = vmul.f32 %v385_v61, %v385_v61 }
 0x1e1   :  { %v388_v0 = vsel %vm372_vm3, %v386_v62, 0.0  ;;  %v389_v1 = vsel %vm372_vm3, %v387_v63, 0.0 }
 0x1e2   :  { %v390_v3 = vadd.f32 %v389_v1, %v388_v0 }
 0x1e4   :  { %v391_v4 = vrot.slane %v390_v3, 4 }
 0x1e6   :  { %v392_v5 = vadd.f32 %v391_v4, %v390_v3 }
 0x1e8   :  { %v393_v6 = vrot.slane %v392_v5, 2 }
 0x1ea   :  { %v394_v7 = vadd.f32 %v393_v6, %v392_v5 }
 0x1ec   :  { %v395_v8 = vrot.slane %v394_v7, 1 }
 0x1ee   :  { %v396_v9 = vadd.f32 %v395_v8, %v394_v7 }
 0x1f0   :  { %v397_v10 = vmul.f32 0.0625, %v396_v9 }
 0x1f2   :  { %v398_v11 = vadd.f32 1e-05, %v397_v10 }
 0x1f4   :  { %997 = vrsqrt.f32 %v398_v11 }
 0x201   :  { %v998_v14 = vpop.eup %997 }
 0x202   :  { %v400_v15 = vmul.f32 %v998_v14, %v384_v60  ;;  %v401_v16 = vmul.f32 %v998_v14, %v385_v61 }
 0x204   :  { %v414_v17 = vmul.f32 %v407_v12, %v400_v15  ;;  %v415_v18 = vmul.f32 %v412_v13, %v401_v16 }
 0x206   :  { %v428_v21 = vadd.f32 %v421_v19, %v414_v17  ;;  %v429_v22 = vadd.f32 %v426_v20, %v415_v18 }
 0x208   :  { %434 = vrot.lane.b32.xlu0 %v428_v21, %s1002_s21  ;;  %436 = vrot.lane.b32.xlu1 %v429_v22, %s1002_s21 }
 0x27a   :  { %v435_v25 = vpop.permute.xlu0 %434  ;;  %v437_v26 = vpop.permute.xlu1 %436 }
 0x27b   :  { %440 = vst.msk [vmem:[#allocation3] sm:$0xff] %vm65_vm1, %v435_v25  ;;  %441 = vst.msk [vmem:[#allocation3 + $0x8] sm:$0xff] %vm65_vm1, %v437_v26 }
 0x282   :  { %v444_v28 = vld [vmem:[#allocation3] sm:$0xff]  ;;  %v445_v29 = vld [vmem:[#allocation3 + $0x8] sm:$0xff] }
 0x283   :  { %451 = vrot.lane.b32.xlu0 %v444_v28, %s1003_s29  ;;  %453 = vrot.lane.b32.xlu1 %v445_v29, %s1003_s29 }
 0x287   :  { %623 = vrot.lane.b32.xlu0 %v444_v28, %s1005_s13  ;;  %625 = vrot.lane.b32.xlu1 %v445_v29, %s1005_s13 }
 0x28b   :  { %721 = vperm.xlu0 %995, %v713_v30   ;;  %716 = vperm.xlu1 %996, %v712_v31  }
 0x28f   :  { %760 = vperm.xlu0 %995, %v756_v32   ;;  %765 = vperm.xlu1 %996, %v757_v33  }
 0x293   :  { %774 = vperm.xlu0 %995, %v770_v34   ;;  %779 = vperm.xlu1 %996, %v771_v35   ;;  %v784_v34 = vld [vmem:[%s1224_s9] sm:$0x1]  ;;  %v791_v35 = vlaneseq }
 0x297   :  { %788 = vperm.xlu1 %996, %v785_v36   ;;  %v792_v36 = vshrl.u32 %v791_v35, 7 }
 0x2f5   :  { %v454_v37 = vpop.permute.xlu1 %453  ;;  %v452_v38 = vpop.permute.xlu0 %451 }
 0x2f6   :  { %961 = vmatprep.subr.mxu1 %v454_v37 }
 0x2f7   :  { %962 = vmatpush3.msra.mxu1 %v454_v37  ;;  %v793_v37 = vsub.s32 0, %v792_v36 }
 0x2f8   :  { %963 = vmatprep.subr.mxu1 %v452_v38 }
 0x2f9   :  { %964 = vmatpush3.msra.mxu1 %v452_v38  ;;  %v626_v40 = vpop.permute.xlu1 %625  ;;  %v624_v42 = vpop.permute.xlu0 %623 }
 0x2fa   :  { %966 = vmatmul.mubr.msk.f32.vlgmr.msra.gmra.mxu1 %vm457_vm4, %v885_v39  ;;  %968 = vmatprep.subr.mxu1 %v445_v29 }
 0x2fb   :  { %975 = vmatprep.subr.mxu0 %v626_v40  ;;  %969 = vmatpush3.msra.mxu1 %v445_v29 }
 0x2fc   :  { %976 = vmatpush3.msra.mxu0 %v626_v40  ;;  %970 = vmatprep.subr.mxu1 %v444_v28 }
 0x2fd   :  { %977 = vmatprep.subr.mxu0 %v624_v42  ;;  %971 = vmatpush3.msra.mxu1 %v444_v28 }
 0x2fe   :  { %972 = vmatprep.mubr.msk.f32.mxu1 %vm457_vm4, %v442_v41  ;;  %978 = vmatpush3.msra.mxu0 %v624_v42 }
 0x2ff   :  { %973 = vmatmul.mubr.msk.f32.vlgmr.msra.gmra.mxu1 %vm457_vm4, %v443_v43  ;;  %980 = vmatmul.mubr.msk.f32.vlgmr.msra.gmra.mxu0 %vm457_vm4, %v891_v44 }
 0x300   :  { %982 = vmatprep.subr.mxu1 %v1001_v2  ;;  %986 = vmatprep.mubr.msk.f32.mxu1 %vm1006_vm5, %v1001_v2 }
 0x306   :  { %v722_v53 = vpop.permute.xlu0 %721  ;;  %v717_v57 = vpop.permute.xlu1 %716 }
 0x30a   :  { %v766_v23 = vpop.permute.xlu1 %765  ;;  %v761_v25 = vpop.permute.xlu0 %760 }
 0x30e   :  { %v780_v30 = vpop.permute.xlu1 %779  ;;  %v775_v32 = vpop.permute.xlu0 %774 }
 0x312   :  { %v789_v38 = vpop.permute.xlu1 %788 }
 0x313   :  { %v794_v39 = vrot.slane %v789_v38, %v793_v37 }
 0x3ba   :  { %v967_v45 = vpop.f32.mrf.mxu1 }
 0x3bc   :  { %v530_v46 = vpop.f32.mrf.mxu1 }
 0x3bf   :  { %v974_v47 = vpop.f32.mrf.mxu1  ;;  %v981_v48 = vpop.f32.mrf.mxu0 }
 0x3c0   :  { %v617_v49 = vadd.f32 %v974_v47, %v967_v45 }
 0x3c1   :  { %v611_v50 = vpop.f32.mrf.mxu1  ;;  %v701_v54 = vpop.f32.mrf.mxu0 }
 0x3c2   :  { %v711_v51 = vadd.f32 %v981_v48, %v617_v49  ;;  %v612_v52 = vadd.f32 %v611_v50, %v530_v46 }
 0x3c4   :  { %v725_v55 = vadd.f32 %v722_v53, %v711_v51  ;;  %v710_v56 = vadd.f32 %v701_v54, %v612_v52 }
 0x3c6   :  { %v727_v58 = vmax.f32 %v725_v55, 0.0  ;;  %v724_v59 = vadd.f32 %v717_v57, %v710_v56 }
 0x3c8   :  { %v726_v60 = vmax.f32 %v724_v59, 0.0  ;;  %v729_v61 = vsel %vm372_vm3, %v727_v58, 0.0 }
 0x3ca   :  { %v728_v62 = vsel %vm372_vm3, %v726_v60, 0.0 }
 0x3cb   :  { %v730_v63 = vadd.f32 %v729_v61, %v728_v62 }
 0x3cd   :  { %v731_v0 = vrot.slane %v730_v63, 4 }
 0x3cf   :  { %v732_v1 = vadd.f32 %v731_v0, %v730_v63 }
 0x3d1   :  { %v733_v3 = vrot.slane %v732_v1, 2 }
 0x3d3   :  { %v734_v4 = vadd.f32 %v733_v3, %v732_v1 }
 0x3d5   :  { %v735_v5 = vrot.slane %v734_v4, 1 }
 0x3d7   :  { %v736_v6 = vadd.f32 %v735_v5, %v734_v4 }
 0x3d9   :  { %v737_v7 = vmul.f32 0.0625, %v736_v6 }
 0x3db   :  { %v738_v8 = vsub.f32 %v726_v60, %v737_v7  ;;  %v739_v9 = vsub.f32 %v727_v58, %v737_v7 }
 0x3dd   :  { %v740_v10 = vmul.f32 %v738_v8, %v738_v8  ;;  %v741_v11 = vmul.f32 %v739_v9, %v739_v9 }
 0x3df   :  { %v742_v12 = vsel %vm372_vm3, %v740_v10, 0.0  ;;  %v743_v13 = vsel %vm372_vm3, %v741_v11, 0.0 }
 0x3e0   :  { %v744_v14 = vadd.f32 %v743_v13, %v742_v12 }
 0x3e2   :  { %v745_v15 = vrot.slane %v744_v14, 4 }
 0x3e4   :  { %v746_v16 = vadd.f32 %v745_v15, %v744_v14 }
 0x3e6   :  { %v747_v17 = vrot.slane %v746_v16, 2 }
 0x3e8   :  { %v748_v18 = vadd.f32 %v747_v17, %v746_v16 }
 0x3ea   :  { %v749_v19 = vrot.slane %v748_v18, 1 }
 0x3ec   :  { %v750_v20 = vadd.f32 %v749_v19, %v748_v18 }
 0x3ee   :  { %v751_v21 = vmul.f32 0.0625, %v750_v20 }
 0x3f0   :  { %v752_v22 = vadd.f32 1e-05, %v751_v21 }
 0x3f2   :  { %999 = vrsqrt.f32 %v752_v22 }
 0x3ff   :  { %v1000_v24 = vpop.eup %999 }
 0x400   :  { %v754_v26 = vmul.f32 %v1000_v24, %v738_v8  ;;  %v755_v27 = vmul.f32 %v1000_v24, %v739_v9 }
 0x402   :  { %v768_v28 = vmul.f32 %v761_v25, %v754_v26  ;;  %v769_v29 = vmul.f32 %v766_v23, %v755_v27 }
 0x404   :  { %v783_v31 = vadd.f32 %v780_v30, %v769_v29  ;;  %v782_v33 = vadd.f32 %v775_v32, %v768_v28 }
 0x406   :  { %983 = vmatpush3.msra.mxu1 %v783_v31 }
 0x407   :  { %984 = vmatprep.subr.mxu1 %v1001_v2 }
 0x408   :  { %985 = vmatpush3.msra.mxu1 %v782_v33 }
 0x409   :  { %987 = vmatmul.mubr.msk.f32.vlgmr.msra.gmra.mxu1 %vm457_vm4, %v784_v34 }
 0x4c9   :  { %v864_v40 = vpop.f32.mrf.mxu1 }
 0x4ca   :  { %v865_v41 = vadd.f32 %v864_v40, %v794_v39 }
 0x4cb   :  { %v988_v42 = vpop.f32.mrf.mxu1 }
 0x4cc   :  { %869 = vst.msk [vmem:[%s1225_s11] sm:$0x1] %vm868_vm6, %v865_v41 }

</bundles_post_ra>
